<compile_context>
chip_gen: v6e
topology: v6e:2x2x1
jax: 0.10.0
libtpu: 0.0.40
codegen_flags: <defaults>
</compile_context>

<pallas_src>
import functools

import jax
import jax.numpy as jnp
from jax.experimental import pallas as pl
from jax.experimental.pallas import tpu as pltpu


def _make_kernel(n_rows: int, tile_n: int, n_tiles: int, inner_tiles: int,
                 num_shards: int):
    needs_mask = (n_tiles * tile_n != n_rows) or (num_shards * inner_tiles != n_tiles)

    def kernel(scal_ref, x_ref, tgt_ref, out_ref):
        # scal_ref: (2,) f32 SMEM  -> [lambda1, output_scale]
        # x_ref:    (tile_n, C)    logits tile (native dtype, cast below)
        # tgt_ref:  (tile_n, 1)    i32 labels tile
        # out_ref:  (1, 1) f32     resident per-shard partial sum
        i = pl.program_id(1)

        @pl.when(i == 0)
        def _init():
            out_ref[...] = jnp.zeros_like(out_ref)

        x = x_ref[...].astype(jnp.float32)                       # (tile_n, C)
        tgt = tgt_ref[...]                                        # (tile_n, 1)

        row_max = jnp.max(x, axis=-1, keepdims=True)              # (tile_n, 1)
        lse = jnp.log(jnp.sum(jnp.exp(x - row_max), axis=-1, keepdims=True))

        # gather(1, target) via a (1, C) lane iota (no full-tile iota temp);
        # gather on raw x so `x - row_max` has a single consumer (the exp/sum).
        col = jax.lax.broadcasted_iota(jnp.int32, (1, x.shape[1]), 1)
        x_gt = jnp.sum(jnp.where(col == tgt, x, 0.0), axis=-1, keepdims=True)

        lam = scal_ref[0]
        # -(1-l)*logpt_gt - l*logpt_pred  ==  lse - (1-l)*(x_gt - row_max)
        loss = lse - (1.0 - lam) * (x_gt - row_max)               # (tile_n, 1)

        if needs_mask:
            global_tile = pl.program_id(0) * inner_tiles + i
            remaining = n_rows - global_tile * tile_n

            @pl.when(remaining >= tile_n)
            def _full_tile():
                out_ref[...] += jnp.sum(loss, axis=(0, 1), keepdims=True)

            @pl.when(remaining < tile_n)
            def _ragged_tile():
                # Ragged last tile / fully out-of-range shard tile: padded rows
                # (possibly garbage/NaN) must contribute exactly 0.
                row = jax.lax.broadcasted_iota(jnp.int32, loss.shape, 0)
                out_ref[...] += jnp.sum(jnp.where(row < remaining, loss, 0.0),
                                        axis=(0, 1), keepdims=True)
        else:
            out_ref[...] += jnp.sum(loss, axis=(0, 1), keepdims=True)

        @pl.when(i == pl.num_programs(1) - 1)
        def _finalize():
            # scale = 1/N for 'mean', 1.0 for 'sum' (precomputed on host).
            out_ref[...] = out_ref[...] * scal_ref[1]

    return kernel


def _vmem_capacity_bytes() -> int:
    try:
        return int(pltpu.get_tpu_info().vmem_capacity_bytes)
    except Exception:
        return 64 << 20  # conservative (v7x per-TensorCore)


def _detect_num_cores() -> int:
    # TODO(synk): confirm the TpuInfo field exposing TensorCores-per-chip on
    # v7x; until then fall back to a single-core grid (always correct).
    try:
        info = pltpu.get_tpu_info()
        for attr in ("num_tensorcores", "tensorcore_count", "num_cores", "core_count"):
            n = getattr(info, attr, None)
            if n:
                return max(1, min(int(n), 8))
    except Exception:
        pass
    return 1


def _per_row_vmem_bytes(n_cols: int, in_bytes: int) -> int:
    # Double-buffered logits tile + in-kernel f32 full-tile temporaries
    # (cast / exp / one-hot product) + lane-padded (tile_n, 1) buffers & temps.
    return 2 * n_cols * in_bytes + 3 * n_cols * 4 + 10 * 512


def _choose_tile_n(n_rows: int, n_cols: int, in_bytes: int, vmem_cap: int) -> int:
    # ~48 MiB working budget on 128 MiB-VMEM parts (v5e/v6e), ~32 MiB on v7x.
    budget = min(vmem_cap // 2, 48 << 20)
    tile = budget // max(_per_row_vmem_bytes(n_cols, in_bytes), 1)
    tile = min(int(tile), 16384)
    align = 16 if in_bytes < 4 else 8
    tile = max(align, (tile // align) * align)
    if tile >= n_rows:
        return n_rows  # single full block (always layout-legal)
    return tile


@functools.partial(jax.jit, static_argnames=("aggregate", "tile_n", "num_shards"))
def label_refine_loss(logits, target, lambda1, aggregate="mean", tile_n=None,
                      num_shards=None):
    """Pallas implementation of LabelRefineLoss.forward (reduced in-kernel)."""
    assert logits.ndim == 2
    if target.ndim == 2:
        target = target[:, 0]
    assert target.ndim == 1
    N, C = logits.shape

    if aggregate == "mean":
        scale = 1.0 / N
    elif aggregate == "sum":
        scale = 1.0
    else:
        # TODO(synk): aggregate=None (per-sample unreduced output) not exposed here.
        raise NotImplementedError("aggregate=None not exposed from this kernel wrapper")

    # Keep bf16 logits in their native dtype on the HBM->VMEM wire; cast to f32
    # inside the kernel (halves input bytes of this HBM-bound kernel).
    if logits.dtype not in (jnp.float32, jnp.bfloat16):
        logits = logits.astype(jnp.float32)
    x = logits
    in_bytes = jnp.dtype(x.dtype).itemsize
    tgt = target.astype(jnp.int32).reshape(N, 1)
    scal = jnp.stack([jnp.asarray(lambda1, jnp.float32),
                      jnp.asarray(scale, jnp.float32)])

    vmem_cap = _vmem_capacity_bytes()
    align = 16 if in_bytes < 4 else 8
    if tile_n is None:
        tile_n = _choose_tile_n(N, C, in_bytes, vmem_cap)
    elif tile_n >= N:
        tile_n = N
    else:
        assert tile_n % align == 0, f"tile_n must be a multiple of {align} or >= N"
    n_tiles = pl.cdiv(N, tile_n)

    if num_shards is None:
        num_shards = _detect_num_cores()
    num_shards = max(1, min(int(num_shards), n_tiles))
    inner = pl.cdiv(n_tiles, num_shards)

    def tile_index(c, i, scal_ref):
        # Shards whose tile range runs past n_tiles re-read the last valid
        # tile; those rows are fully masked out inside the kernel.
        return (jnp.minimum(c * inner + i, n_tiles - 1), 0)

    footprint = tile_n * _per_row_vmem_bytes(C, in_bytes) + (2 << 20)
    vmem_limit = int(min(max(footprint + (8 << 20), 32 << 20),
                         min(vmem_cap - (2 << 20), 96 << 20)))

    out = pl.pallas_call(
        _make_kernel(N, tile_n, n_tiles, inner, num_shards),
        out_shape=jax.ShapeDtypeStruct((num_shards, 1, 1), jnp.float32),
        grid_spec=pltpu.PrefetchScalarGridSpec(
            num_scalar_prefetch=1,                      # [lambda1, scale] -> SMEM
            grid=(num_shards, inner),
            in_specs=[
                pl.BlockSpec((tile_n, C), tile_index),  # logits tile (native dtype)
                pl.BlockSpec((tile_n, 1), tile_index),  # labels tile
            ],
            out_specs=pl.BlockSpec((None, 1, 1), lambda c, i, s: (c, 0, 0)),
        ),
        compiler_params=pltpu.CompilerParams(
            dimension_semantics=("parallel", "arbitrary"),
            vmem_limit_bytes=vmem_limit,
        ),
    )(scal, x, tgt)

    # Per-shard partials are already scaled; total is their sum.
    return jnp.sum(out)


if __name__ == "__main__":
    key = jax.random.PRNGKey(0)
    k1, k2 = jax.random.split(key)
    lambda1 = 0.3

    def reference(x, t, lam):
        logpt = jax.nn.log_softmax(x.astype(jnp.float32), axis=1)
        lgt = jnp.take_along_axis(logpt, t[:, None], axis=1)[:, 0]
        lpred = jnp.max(logpt, axis=1)
        return -(1.0 - lam) * lgt - lam * lpred

    # 1) f32, default tiling (single full block), aggregate='mean'.
    N, C = 13, 32
    logits = jax.random.normal(k1, (N, C), dtype=jnp.float32)
    target = jax.random.randint(k2, (N,), 0, C, dtype=jnp.int32)
    per = reference(logits, target, lambda1)

    loss_mean = label_refine_loss(logits, target, lambda1, aggregate="mean")
    jax.block_until_ready(loss_mean)
    assert jnp.allclose(loss_mean, per.mean(), atol=1e-5, rtol=1e-5), (
        loss_mean, per.mean())

    # 2) Forced multi-tile path with a ragged last tile, aggregate='sum'.
    loss_sum = label_refine_loss(logits, target, lambda1, aggregate="sum", tile_n=8)
    jax.block_until_ready(loss_sum)
    assert jnp.allclose(loss_sum, per.sum(), atol=1e-4, rtol=1e-5), (
        loss_sum, per.sum())

    # 3) bf16 native-dtype path + 2-shard grid (ragged last tile AND a fully
    #    out-of-range, clamped shard tile), aggregate='mean'.
    N2, C2 = 35, 48
    l2 = jax.random.normal(k1, (N2, C2), dtype=jnp.float32).astype(jnp.bfloat16)
    t2 = jax.random.randint(k2, (N2,), 0, C2, dtype=jnp.int32)
    per2 = reference(l2, t2, lambda1)
    loss2 = label_refine_loss(l2, t2, lambda1, aggregate="mean",
                              tile_n=16, num_shards=2)
    jax.block_until_ready(loss2)
    assert jnp.allclose(loss2, per2.mean(), atol=1e-3, rtol=1e-3), (
        loss2, per2.mean())

    print("KERNEL_OK")
</pallas_src>

<mosaic_0001>
module attributes {stable_mosaic.version = 11 : i64} {
  func.func @kernel(%arg0: i32, %arg1: i32, %arg2: memref<2xf32, #tpu.memory_space<smem>>, %arg3: memref<13x32xf32, #tpu.memory_space<vmem>>, %arg4: memref<13x1xi32, #tpu.memory_space<vmem>>, %arg5: memref<1x1x1xf32, #tpu.memory_space<vmem>>) attributes {dimension_semantics = [#tpu.dimension_semantics<parallel>, #tpu.dimension_semantics<arbitrary>], iteration_bounds = array<i64: 1, 1>, scalar_prefetch = 1 : i64, scratch_operands = 0 : i64, tpu.core_type = #tpu.core_type<tc>, window_params = [{transform_indices = @transform_0, window_bounds = array<i64: 13, 32>}, {transform_indices = @transform_1, window_bounds = array<i64: 13, 1>}, {transform_indices = @transform_2, window_bounds = array<i64: 1, 1, 1>}]} {
    %c0_i32 = arith.constant 0 : i32
    %0 = arith.cmpi eq, %arg1, %c0_i32 : i32
    %1 = arith.extui %0 : i1 to i32
    %c0_i32_0 = arith.constant 0 : i32
    %2 = arith.cmpi ne, %1, %c0_i32_0 : i32
    scf.if %2 {
      %cst_18 = arith.constant 0.000000e+00 : f32
      %41 = vector.broadcast %cst_18 : f32 to vector<1x1xf32>
      %c0_19 = arith.constant 0 : index
      %c0_20 = arith.constant 0 : index
      %c0_21 = arith.constant 0 : index
      %42 = vector.load %arg5[%c0_19, %c0_20, %c0_21] : memref<1x1x1xf32, #tpu.memory_space<vmem>>, vector<1x1x1xf32>
      %43 = vector.shape_cast %42 : vector<1x1x1xf32> to vector<1x1xf32>
      %44 = vector.shape_cast %41 : vector<1x1xf32> to vector<1x1x1xf32>
      tpu.vector_store %arg5[%c0_19, %c0_20, %c0_21], %44 {strides = array<i32>} : memref<1x1x1xf32, #tpu.memory_space<vmem>>, vector<1x1x1xf32>,
    } else {
    }
    %c0 = arith.constant 0 : index
    %c0_1 = arith.constant 0 : index
    %3 = vector.load %arg3[%c0, %c0_1] : memref<13x32xf32, #tpu.memory_space<vmem>>, vector<13x32xf32>
    %c0_2 = arith.constant 0 : index
    %c0_3 = arith.constant 0 : index
    %4 = vector.load %arg4[%c0_2, %c0_3] : memref<13x1xi32, #tpu.memory_space<vmem>>, vector<13x1xi32>
    %cst = arith.constant dense<0xFF800000> : vector<13xf32>
    %5 = vector.multi_reduction <maximumf>, %3, %cst [1] : vector<13x32xf32> to vector<13xf32>
    %6 = vector.shape_cast %5 : vector<13xf32> to vector<13x1xf32>
    %7 = vector.broadcast %6 : vector<13x1xf32> to vector<13x32xf32>
    %8 = arith.subf %3, %7 : vector<13x32xf32>
    %9 = math.exp %8 : vector<13x32xf32>
    %cst_4 = arith.constant dense<0.000000e+00> : vector<13xf32>
    %10 = vector.multi_reduction <add>, %9, %cst_4 [1] : vector<13x32xf32> to vector<13xf32>
    %11 = vector.shape_cast %10 : vector<13xf32> to vector<13x1xf32>
    %12 = math.log %11 : vector<13x1xf32>
    %13 = tpu.iota {dimensions = array<i32: 1>} : vector<1x32xi32>
    %14 = vector.broadcast %13 : vector<1x32xi32> to vector<13x32xi32>
    %15 = vector.broadcast %4 : vector<13x1xi32> to vector<13x32xi32>
    %16 = arith.cmpi eq, %14, %15 : vector<13x32xi32>
    %cst_5 = arith.constant 0.000000e+00 : f32
    %17 = vector.broadcast %cst_5 : f32 to vector<13x32xf32>
    %18 = arith.select %16, %3, %17 : vector<13x32xi1>, vector<13x32xf32>
    %cst_6 = arith.constant dense<0.000000e+00> : vector<13xf32>
    %19 = vector.multi_reduction <add>, %18, %cst_6 [1] : vector<13x32xf32> to vector<13xf32>
    %20 = vector.shape_cast %19 : vector<13xf32> to vector<13x1xf32>
    %c0_7 = arith.constant 0 : index
    %21 = memref.load %arg2[%c0_7] : memref<2xf32, #tpu.memory_space<smem>>
    %cst_8 = arith.constant 1.000000e+00 : f32
    %22 = arith.subf %cst_8, %21 : f32
    %23 = arith.subf %20, %6 : vector<13x1xf32>
    %24 = vector.broadcast %22 : f32 to vector<13x1xf32>
    %25 = arith.mulf %24, %23 : vector<13x1xf32>
    %26 = arith.subf %12, %25 : vector<13x1xf32>
    %c0_9 = arith.constant 0 : index
    %c0_10 = arith.constant 0 : index
    %c0_11 = arith.constant 0 : index
    %27 = vector.load %arg5[%c0_9, %c0_10, %c0_11] : memref<1x1x1xf32, #tpu.memory_space<vmem>>, vector<1x1x1xf32>
    %28 = vector.shape_cast %27 : vector<1x1x1xf32> to vector<1x1xf32>
    %29 = vector.shape_cast %26 : vector<13x1xf32> to vector<1x13x1xf32>
    %cst_12 = arith.constant dense<0.000000e+00> : vector<1xf32>
    %30 = vector.multi_reduction <add>, %29, %cst_12 [1, 2] : vector<1x13x1xf32> to vector<1xf32>
    %31 = vector.shape_cast %30 : vector<1xf32> to vector<1x1x1xf32>
    %32 = vector.extract %31[0, 0, 0] : f32 from vector<1x1x1xf32>
    %33 = vector.broadcast %32 : f32 to vector<1x1xf32>
    %34 = arith.addf %28, %33 : vector<1x1xf32>
    %c0_13 = arith.constant 0 : index
    %c0_14 = arith.constant 0 : index
    %c0_15 = arith.constant 0 : index
    %35 = vector.load %arg5[%c0_13, %c0_14, %c0_15] : memref<1x1x1xf32, #tpu.memory_space<vmem>>, vector<1x1x1xf32>
    %36 = vector.shape_cast %35 : vector<1x1x1xf32> to vector<1x1xf32>
    %37 = vector.shape_cast %34 : vector<1x1xf32> to vector<1x1x1xf32>
    tpu.vector_store %arg5[%c0_13, %c0_14, %c0_15], %37 {strides = array<i32>} : memref<1x1x1xf32, #tpu.memory_space<vmem>>, vector<1x1x1xf32>,
    %c0_i32_16 = arith.constant 0 : i32
    %38 = arith.cmpi eq, %arg1, %c0_i32_16 : i32
    %39 = arith.extui %38 : i1 to i32
    %c0_i32_17 = arith.constant 0 : i32
    %40 = arith.cmpi ne, %39, %c0_i32_17 : i32
    scf.if %40 {
      %c0_18 = arith.constant 0 : index
      %c0_19 = arith.constant 0 : index
      %c0_20 = arith.constant 0 : index
      %41 = vector.load %arg5[%c0_18, %c0_19, %c0_20] : memref<1x1x1xf32, #tpu.memory_space<vmem>>, vector<1x1x1xf32>
      %42 = vector.shape_cast %41 : vector<1x1x1xf32> to vector<1x1xf32>
      %c1 = arith.constant 1 : index
      %43 = memref.load %arg2[%c1] : memref<2xf32, #tpu.memory_space<smem>>
      %44 = vector.broadcast %43 : f32 to vector<1x1xf32>
      %45 = arith.mulf %42, %44 : vector<1x1xf32>
      %c0_21 = arith.constant 0 : index
      %c0_22 = arith.constant 0 : index
      %c0_23 = arith.constant 0 : index
      %46 = vector.load %arg5[%c0_21, %c0_22, %c0_23] : memref<1x1x1xf32, #tpu.memory_space<vmem>>, vector<1x1x1xf32>
      %47 = vector.shape_cast %46 : vector<1x1x1xf32> to vector<1x1xf32>
      %48 = vector.shape_cast %45 : vector<1x1xf32> to vector<1x1x1xf32>
      tpu.vector_store %arg5[%c0_21, %c0_22, %c0_23], %48 {strides = array<i32>} : memref<1x1x1xf32, #tpu.memory_space<vmem>>, vector<1x1x1xf32>,
    } else {
    }
    return
  }
  func.func @transform_0(%arg0: i32, %arg1: i32, %arg2: memref<2xf32, #tpu.memory_space<smem>>) -> (i32, i32) {
    %c1_i32 = arith.constant 1 : i32
    %0 = arith.muli %arg0, %c1_i32 : i32
    %1 = arith.addi %0, %arg1 : i32
    %c0_i32 = arith.constant 0 : i32
    %2 = arith.minsi %1, %c0_i32 : i32
    %c0_i32_0 = arith.constant 0 : i32
    %c0_i32_1 = arith.constant 0 : i32
    return %2, %c0_i32_0 : i32, i32
  }
  func.func @transform_1(%arg0: i32, %arg1: i32, %arg2: memref<2xf32, #tpu.memory_space<smem>>) -> (i32, i32) {
    %c1_i32 = arith.constant 1 : i32
    %0 = arith.muli %arg0, %c1_i32 : i32
    %1 = arith.addi %0, %arg1 : i32
    %c0_i32 = arith.constant 0 : i32
    %2 = arith.minsi %1, %c0_i32 : i32
    %c0_i32_0 = arith.constant 0 : i32
    %c0_i32_1 = arith.constant 0 : i32
    return %2, %c0_i32_0 : i32, i32
  }
  func.func @transform_2(%arg0: i32, %arg1: i32, %arg2: memref<2xf32, #tpu.memory_space<smem>>) -> (i32, i32, i32) {
    %c0_i32 = arith.constant 0 : i32
    %c0_i32_0 = arith.constant 0 : i32
    %c0_i32_1 = arith.constant 0 : i32
    return %arg0, %c0_i32, %c0_i32_0 : i32, i32, i32
  }
}

</mosaic_0001>

<bundles_post_ra>
// kernel: label_refine_loss.1
= control target key start
LH: loop header
LB: loop body
LE: loop exit
PB: predicated region body
PF: predicated region fallthrough
CT: control target
= control target key end

     0   :  { %s301_s0 = inlined_call_operand.vmem [shape: f32[2], index: 0, kind: input, shape index: {}]   ;;  %s302_s1 = inlined_call_operand.vmem [shape: f32[13,32], index: 1, kind: input, shape index: {}]   ;;  %s303_s2 = inlined_call_operand.vmem [shape: s32[13,1], index: 2, kind: input, shape index: {}]   ;;  %s304_s3 = inlined_call_operand.hbm [shape: f32[1,1,1], index: 3, kind: output, shape index: {}]  }
   0x1   :  { %s8_s14 = sshll.u32 %s301_s0, 4  ;;  %s9_s14 = int_to_ptr.vmem [resolvable:$true] %s8_s14 }
   0x2   :  { %s214_s15 = scalar_lea.vmem %s9_s14, 16  ;;  %p219_p1 = scmp.lt.s32.totalorder %s9_s14, %s9_s14 }
   0x3   :  { %p215_p0 = scmp.ne.s32.totalorder %s9_s14, %s214_s15  ;;  %p220_p2 = scmp.lt.s32.totalorder %s214_s15, %s214_s15 }
   0x5   :  { %p221_p3 = por %p220_p2, %p219_p1 }
   0x7   :  { %p222_p4 = pnand %p221_p3, %p215_p0 }
   0x9   :  { %225 = shalt.err (!%p222_p4)  }
   0xa   :  { %s250_s16 = smov [#allocation3]  }
   0xb   :  { %11 = dma.vmem_to_smem %s9_s14, 16, %s250_s16, [#allocation2] }
   0xc   :  { %246 = dma.done.wait [#allocation2], 16 }
   0xd   :  { %247 = vsyncadd [#allocation2], 4294967280 }
   0xe   :  { %13 = sfence }
   0xf   :  { %v89_v0 = vld [vmem:[%s302_s1] sm:$0xff]  ;;  %vm93_vm0 = vcmask 261120   ;;  %v90_v1 = vld [vmem:[%s302_s1 + $0x8] sm:$0x1f]  ;;  %vm97_vm1 = vcmask 258048   ;;  %v251_v3 = vmov 0  }
  0x10   :  { %v94_v2 = vsel %vm93_vm0, %v89_v0, -inf  ;;  %204 = vset.pattern.permute.xlu1 %v251_v3  ;;  %v91_v4 = vld [vmem:[%s303_s2] sm:$0xff]  ;;  %205 = vset.pattern.permute.xlu0 %v251_v3 }
  0x11   :  { %95 = vmax.xlane.f32.xlu0 %v94_v2  ;;  %120 = vperm.xlu1 %204, %v91_v4  }
  0x12   :  { %14 = vsyncpa [#allocation5], 0  ;;  %v98_v5 = vsel %vm97_vm1, %v90_v1, -inf  ;;  %v92_v6 = vld [vmem:[%s303_s2 + $0x8] sm:$0x1f]  ;;  %v117_v13 = vlaneseq  ;;  %s135_s1 = sld [smem:[#allocation3]] }
  0x13   :  { %vm145_vm4 = vcmask 7168   ;;  %vm147_vm5 = vcmask 4096   ;;  %vm87_vm6 = vcmask 0   ;;  %v252_v43 = vmov 0.0   ;;  %s197_s25 = sld [smem:[#allocation3 + $0x1]]  ;;  %s253_s26 = smov [#allocation4]  }
  0x14   :  { %v118_v15 = vand.u32 127, %v117_v13  ;;  %88 = vst.msk [vmem:[#allocation4] sm:$0x1] %vm87_vm6, %v252_v43  ;;  %s177_s27 = sshll.u32 %s253_s26, 4  ;;  %s178_s27 = int_to_ptr.vmem [resolvable:$true] %s177_s27 }
  0x15   :  { %99 = vmax.xlane.f32.xlu0 %v98_v5  ;;  %123 = vperm.xlu1 %204, %v92_v6   ;;  %s226_s28 = scalar_lea.vmem %s178_s27, 16  ;;  %s230_s29 = scalar_lea.vmem %s178_s27, 32 }
  0x16   :  { %p227_p5 = scmp.ne.s32.totalorder %s178_s27, %s226_s28  ;;  %p231_p6 = scmp.lt.s32.totalorder %s178_s27, %s178_s27 }
  0x17   :  { %p232_p7 = scmp.lt.s32.totalorder %s230_s29, %s226_s28 }
  0x18   :  { %s136_s2 = ssub.f32 1.0, %s135_s1 }
  0x19   :  { %v168_v54 = vstv %s197_s25  ;;  %p233_p8 = por %p232_p7, %p231_p6 }
  0x1a   :  { %v139_v31 = vstv %s136_s2 }
  0x1b   :  { %v144_v51 = vld [vmem:[#allocation4] sm:$0x1]  ;;  %p234_p9 = pnand %p233_p8, %p227_p5 }
  0x8c   :  { %v121_v14 = vpop.permute.xlu1 %120 }
  0x8d   :  { %vm125_vm2 = vcmp.eq.s32.totalorder %v118_v15, %v121_v14 }
  0x8e   :  { %v127_v18 = vsel %vm125_vm2, %v89_v0, 0.0 }
  0x8f   :  { %v129_v20 = vsel %vm93_vm0, %v127_v18, 0.0 }
  0x90   :  { %v124_v16 = vpop.permute.xlu1 %123 }
  0x91   :  { %vm126_vm3 = vcmp.eq.s32.totalorder %v118_v15, %v124_v16 }
  0x92   :  { %v128_v22 = vsel %vm126_vm3, %v90_v1, 0.0 }
  0x93   :  { %v132_v24 = vsel %vm97_vm1, %v128_v22, 0.0 }
  0x9a   :  { %v96_v7 = vpop.xlane.xlu0 %95 }
  0x9b   :  { %v101_v8 = vsub.f32 %v89_v0, %v96_v7 }
  0x9d   :  { %v103_v9 = vmul.f32 1.442695, %v101_v8 }
  0x9e   :  { %v100_v10 = vpop.xlane.xlu0 %99 }
  0x9f   :  { %206 = vpow2.f32 %v103_v9  ;;  %v102_v11 = vsub.f32 %v90_v1, %v100_v10 }
  0xa1   :  { %v105_v12 = vmul.f32 1.442695, %v102_v11 }
  0xa3   :  { %208 = vpow2.f32 %v105_v12 }
  0xac   :  { %v207_v17 = vpop.eup %206 }
  0xad   :  { %v107_v19 = vsel %vm93_vm0, %v207_v17, 0.0 }
  0xae   :  { %108 = vadd.xlane.f32.xlu0 %v107_v19 }
  0xb0   :  { %v209_v21 = vpop.eup %208 }
  0xb1   :  { %v110_v23 = vsel %vm97_vm1, %v209_v21, 0.0 }
  0xb2   :  { %130 = vadd.xlane.f32.xlu0 %v129_v20  ;;  %111 = vadd.xlane.f32.xlu1 %v110_v23 }
  0xb6   :  { %133 = vadd.xlane.f32.xlu0 %v132_v24 }
 0x137   :  { %v109_v25 = vpop.xlane.xlu0 %108 }
 0x138   :  { %210 = vlog2.f32 %v109_v25 }
 0x13b   :  { %v112_v26 = vpop.xlane.xlu1 %111  ;;  %v131_v27 = vpop.xlane.xlu0 %130 }
 0x13c   :  { %212 = vlog2.f32 %v112_v26  ;;  %v137_v29 = vsub.f32 %v131_v27, %v96_v7 }
 0x13e   :  { %v140_v34 = vmul.f32 %v139_v31, %v137_v29 }
 0x13f   :  { %v134_v28 = vpop.xlane.xlu0 %133 }
 0x140   :  { %v138_v33 = vsub.f32 %v134_v28, %v100_v10 }
 0x142   :  { %v141_v37 = vmul.f32 %v139_v31, %v138_v33 }
 0x145   :  { %v211_v30 = vpop.eup %210 }
 0x146   :  { %v114_v32 = vmul.f32 0.6931472, %v211_v30 }
 0x148   :  { %v142_v38 = vsub.f32 %v114_v32, %v140_v34 }
 0x149   :  { %v213_v35 = vpop.eup %212 }
 0x14a   :  { %v116_v36 = vmul.f32 0.6931472, %v213_v35  ;;  %v146_v40 = vsel %vm145_vm4, %v142_v38, 0.0 }
 0x14c   :  { %v143_v39 = vsub.f32 %v116_v36, %v141_v37 }
 0x14e   :  { %v148_v41 = vsel %vm147_vm5, %v143_v39, 0.0 }
 0x14f   :  { %v149_v42 = vadd.f32 %v148_v41, %v146_v40 }
 0x151   :  { %150 = vadd.xlane.f32.xlu0 %v149_v42 }
 0x1da   :  { %v151_v44 = vpop.xlane.xlu0 %150 }
 0x1db   :  { %v152_v45 = vrot.slane %v151_v44, 4 }
 0x1dd   :  { %v153_v46 = vadd.f32 %v152_v45, %v151_v44 }
 0x1df   :  { %v154_v47 = vrot.slane %v153_v46, 2 }
 0x1e1   :  { %v155_v48 = vadd.f32 %v154_v47, %v153_v46 }
 0x1e3   :  { %v156_v49 = vrot.slane %v155_v48, 1 }
 0x1e5   :  { %v157_v50 = vadd.f32 %v156_v49, %v155_v48 }
 0x1e7   :  { %198 = vpush %v157_v50 }
 0x218   :  { %s199_s24 = spop %198 }
 0x219   :  { %v159_v52 = vstv %s199_s24 }
 0x21a   :  { %v160_v53 = vadd.f32 %v159_v52, %v144_v51 }
 0x21c   :  { %162 = vst.msk [vmem:[#allocation4] sm:$0x1] %vm87_vm6, %v160_v53 }
 0x223   :  { %v166_v55 = vld [vmem:[#allocation4] sm:$0x1] }
 0x224   :  { %v169_v56 = vmul.f32 %v168_v54, %v166_v55 }
 0x226   :  { %170 = vst.msk [vmem:[#allocation4] sm:$0x1] %vm87_vm6, %v169_v56 }
 0x227   :  { %237 = shalt.err (!%p234_p9)
}
 0x228   :  { %180 = dma.vmem_to_hbm [thread:$0]  %s178_s27, 16, %s304_s3, [#allocation5]  }
 0x229   :  { %248 = dma.done.wait [#allocation5], 16  }
 0x22a   :  { %249 = vsyncadd [#allocation5], 4294967280 }
 0x22b   :  { %184 = vsyncpa [#allocation5], 1 }

</bundles_post_ra>
